<compile_context>
chip_gen: v7x
topology: tpu7x:2x2x1
jax: 0.10.0
libtpu: 0.0.40
codegen_flags: <defaults>
</compile_context>

<pallas_src>
import functools

import jax
import jax.numpy as jnp
from jax.experimental import pallas as pl
from jax.experimental.pallas import tpu as pltpu


def _gls_kernel(logits_ref, tgt_ref, loss_ref, cnt_ref, acc_loss, acc_cnt,
                *, padding_idx, alpha, num_classes):
    i = pl.program_id(1)
    n_i = pl.num_programs(1)

    @pl.when(i == 0)
    def _():
        acc_loss[...] = jnp.zeros_like(acc_loss)
        acc_cnt[...] = jnp.zeros_like(acc_cnt)

    C = num_classes
    x = logits_ref[...].astype(jnp.float32)               # [TM, C]
    tgt = tgt_ref[...]                                     # [TM, 1] int32

    # Shifted logits: everything below is derived from xm = x - max(x).
    m = jnp.max(x, axis=-1, keepdims=True)                 # [TM, 1]
    xm = x - m                                             # [TM, C]

    sumexp = jnp.sum(jnp.exp(xm), axis=-1, keepdims=True)  # [TM, 1]
    log_sum = jnp.log(sumexp)
    pred_prob = 1.0 / sumexp                               # max softmax prob

    sum_xm = jnp.sum(xm, axis=-1, keepdims=True)           # [TM, 1]
    col = jax.lax.broadcasted_iota(jnp.int32, xm.shape, 1)
    xm_t = jnp.sum(jnp.where(col == tgt, xm, 0.0), axis=-1, keepdims=True)

    lp_t = xm_t - log_sum                                  # logprob at target
    sum_lp = sum_xm - C * log_sum                          # sum_j logprob_j

    # graduated smoothing from the predicted confidence
    s = jnp.full_like(pred_prob, alpha)
    s = jnp.where(pred_prob >= 0.7, 3.0 * alpha, s)
    s = jnp.where(pred_prob <= 0.3, 0.0, s)

    u = s / (C - 1)                                        # off-target mass
    conf = 1.0 - C * u                                     # target mass

    # KLDiv(log_softmax, true_dist) summed over classes, per row.
    # Zero-mass entries contribute exactly 0 (PyTorch xlogy convention).
    safe_u = jnp.where(u > 0, u, 1.0)
    safe_c = jnp.where(conf > 0, conf, 1.0)
    off_term = jnp.where(
        u > 0, u * ((C - 1) * jnp.log(safe_u) - (sum_lp - lp_t)), 0.0)
    tgt_term = jnp.where(conf > 0, conf * (jnp.log(safe_c) - lp_t), 0.0)

    valid = (tgt != padding_idx).astype(jnp.float32)       # [TM, 1]
    acc_loss[...] += (off_term + tgt_term) * valid
    acc_cnt[...] += valid

    @pl.when(i == n_i - 1)
    def _():
        loss_ref[...] = jnp.sum(acc_loss[...]).reshape(1, 1, 1)
        cnt_ref[...] = jnp.sum(acc_cnt[...]).reshape(1, 1, 1)


def graduated_label_smoothing_attn_loss(logits, target, *, alpha=0.0,
                                        padding_idx=0, normalize_length=True,
                                        num_core_slices=2, max_row_tile=1024):
    """logits: [..., C] (any float dtype), target: [...] int."""
    C = logits.shape[-1]
    batch_size = logits.shape[0]
    x = logits.reshape(-1, C)                 # keep original dtype (e.g. bf16)
    t = target.reshape(-1).astype(jnp.int32)
    N = x.shape[0]

    # --- choose a row tile that sits comfortably inside scoped VMEM --------
    itemsize = jnp.dtype(x.dtype).itemsize
    # 2x double-buffered logits tile + ~3 f32 [TM, C] temporaries in the body
    # (kept conservative; the kernel itself keeps roughly 2 alive).
    bytes_per_row = 2 * C * itemsize + 3 * C * 4
    vmem_budget = 24 * 1024 * 1024
    row_tile = max(8, min(max_row_tile, vmem_budget // max(bytes_per_row, 1)))
    row_tile = (row_tile // 8) * 8
    rows_per_slice_min = -(-N // num_core_slices)
    row_tile = max(8, min(row_tile, ((rows_per_slice_min + 7) // 8) * 8))

    # --- pad rows so every core slice has an integral number of tiles ------
    chunk = row_tile * num_core_slices
    N_pad = -(-N // chunk) * chunk
    pad = N_pad - N
    if pad:
        x = jnp.pad(x, ((0, pad), (0, 0)))
        t = jnp.pad(t, (0, pad), constant_values=padding_idx)
    t2 = t.reshape(N_pad, 1)

    rows_per_slice = N_pad // num_core_slices
    steps = rows_per_slice // row_tile

    kernel = functools.partial(_gls_kernel, padding_idx=padding_idx,
                               alpha=float(alpha), num_classes=C)

    loss_parts, cnt_parts = pl.pallas_call(
        kernel,
        out_shape=(jax.ShapeDtypeStruct((num_core_slices, 1, 1), jnp.float32),
                   jax.ShapeDtypeStruct((num_core_slices, 1, 1), jnp.float32)),
        grid_spec=pltpu.PrefetchScalarGridSpec(
            num_scalar_prefetch=0,
            grid=(num_core_slices, steps),
            in_specs=[
                pl.BlockSpec((row_tile, C), lambda c, i: (c * steps + i, 0)),
                pl.BlockSpec((row_tile, 1), lambda c, i: (c * steps + i, 0)),
            ],
            out_specs=[
                pl.BlockSpec((1, 1, 1), lambda c, i: (c, 0, 0)),
                pl.BlockSpec((1, 1, 1), lambda c, i: (c, 0, 0)),
            ],
            scratch_shapes=[pltpu.VMEM((row_tile, 1), jnp.float32),
                            pltpu.VMEM((row_tile, 1), jnp.float32)],
        ),
        compiler_params=pltpu.CompilerParams(
            dimension_semantics=("parallel", "arbitrary"),
            vmem_limit_bytes=48 * 1024 * 1024,
        ),
    )(x, t2)

    loss_sum = jnp.sum(loss_parts)
    total = jnp.sum(cnt_parts)
    # NOTE: total == 0 (all rows ignored) yields NaN, same as the reference.
    denom = total if normalize_length else jnp.float32(batch_size)
    return loss_sum / denom


def _reference(logits, target, *, alpha, padding_idx=0, normalize_length=True):
    """Plain-JAX transcription of the PyTorch forward, for validation."""
    C = logits.shape[-1]
    batch_size = logits.shape[0]
    x = logits.reshape(-1, C).astype(jnp.float32)
    t = target.reshape(-1).astype(jnp.int32)
    N = x.shape[0]

    probs = jax.nn.softmax(x, axis=-1)
    pred_prob = probs.max(axis=-1)
    s = jnp.full((N,), alpha, jnp.float32)
    s = jnp.where(pred_prob >= 0.7, 3.0 * alpha, s)
    s = jnp.where(pred_prob <= 0.3, 0.0, s)

    true_dist = jnp.broadcast_to((s / (C - 1))[:, None], (N, C))
    confidence = 1.0 - true_dist.sum(-1)
    true_dist = true_dist.at[jnp.arange(N), t].set(confidence)

    logp = jax.nn.log_softmax(x, axis=-1)
    safe = jnp.where(true_dist > 0, true_dist, 1.0)
    kl = jnp.where(true_dist > 0, true_dist * (jnp.log(safe) - logp), 0.0)

    ignore = (t == padding_idx)
    kl = jnp.where(ignore[:, None], 0.0, kl)
    total = N - ignore.sum()
    denom = total if normalize_length else batch_size
    return kl.sum() / denom


if __name__ == "__main__":
    key = jax.random.PRNGKey(0)
    batch, seq, num_classes = 2, 8, 128
    alpha = 0.1

    k1, k2 = jax.random.split(key)
    logits = jax.random.normal(k1, (batch, seq, num_classes), dtype=jnp.float32)
    # exercise the p >= 0.7 branch (one very confident row) ...
    logits = logits.at[0, 1, 5].add(10.0)
    # ... and the 0.3 < p < 0.7 branch (one row with p == 0.5)
    mid_row = jnp.zeros((num_classes,), jnp.float32).at[7].set(jnp.log(127.0))
    logits = logits.at[1, 2].set(mid_row)
    # feed bf16 to the kernel: streaming is memory-bound, halve the bytes.
    logits = logits.astype(jnp.bfloat16)

    target = jax.random.randint(k2, (batch, seq), 1, num_classes,
                                dtype=jnp.int32)
    target = target.at[0, 0].set(0)   # exercise the ignore_index path

    out = graduated_label_smoothing_attn_loss(
        logits, target, alpha=alpha, padding_idx=0, normalize_length=True)
    out = jax.block_until_ready(out)

    ref = _reference(logits, target, alpha=alpha, padding_idx=0,
                     normalize_length=True)
    assert jnp.allclose(out, ref, rtol=1e-4, atol=1e-4), (out, ref)

    print("KERNEL_OK")
</pallas_src>

<mosaic_0001>
module attributes {stable_mosaic.version = 11 : i64} {
  func.func @_gls_kernel(%arg0: i32, %arg1: i32, %arg2: memref<8x128xbf16, #tpu.memory_space<vmem>>, %arg3: memref<8x1xi32, #tpu.memory_space<vmem>>, %arg4: memref<1x1x1xf32, #tpu.memory_space<vmem>>, %arg5: memref<1x1x1xf32, #tpu.memory_space<vmem>>, %arg6: memref<8x1xf32, #tpu.memory_space<vmem>>, %arg7: memref<8x1xf32, #tpu.memory_space<vmem>>) attributes {dimension_semantics = [#tpu.dimension_semantics<parallel>, #tpu.dimension_semantics<arbitrary>], iteration_bounds = array<i64: 2, 1>, scalar_prefetch = 0 : i64, scratch_operands = 2 : i64, tpu.core_type = #tpu.core_type<tc>, window_params = [{transform_indices = @transform_0, window_bounds = array<i64: 8, 128>}, {transform_indices = @transform_1, window_bounds = array<i64: 8, 1>}, {transform_indices = @transform_2, window_bounds = array<i64: 1, 1, 1>}, {transform_indices = @transform_3, window_bounds = array<i64: 1, 1, 1>}]} {
    %c0_i32 = arith.constant 0 : i32
    %0 = arith.cmpi eq, %arg1, %c0_i32 : i32
    %1 = arith.extui %0 : i1 to i32
    %c0_i32_0 = arith.constant 0 : i32
    %2 = arith.cmpi ne, %1, %c0_i32_0 : i32
    scf.if %2 {
      %cst_38 = arith.constant 0.000000e+00 : f32
      %84 = vector.broadcast %cst_38 : f32 to vector<8x1xf32>
      %c0_39 = arith.constant 0 : index
      %c0_40 = arith.constant 0 : index
      %85 = vector.load %arg6[%c0_39, %c0_40] : memref<8x1xf32, #tpu.memory_space<vmem>>, vector<8x1xf32>
      tpu.vector_store %arg6[%c0_39, %c0_40], %84 {strides = array<i32>} : memref<8x1xf32, #tpu.memory_space<vmem>>, vector<8x1xf32>,
      %cst_41 = arith.constant 0.000000e+00 : f32
      %86 = vector.broadcast %cst_41 : f32 to vector<8x1xf32>
      %c0_42 = arith.constant 0 : index
      %c0_43 = arith.constant 0 : index
      %87 = vector.load %arg7[%c0_42, %c0_43] : memref<8x1xf32, #tpu.memory_space<vmem>>, vector<8x1xf32>
      tpu.vector_store %arg7[%c0_42, %c0_43], %86 {strides = array<i32>} : memref<8x1xf32, #tpu.memory_space<vmem>>, vector<8x1xf32>,
    } else {
    }
    %c0 = arith.constant 0 : index
    %c0_1 = arith.constant 0 : index
    %3 = vector.load %arg2[%c0, %c0_1] : memref<8x128xbf16, #tpu.memory_space<vmem>>, vector<8x128xbf16>
    %4 = arith.extf %3 : vector<8x128xbf16> to vector<8x128xf32>
    %c0_2 = arith.constant 0 : index
    %c0_3 = arith.constant 0 : index
    %5 = vector.load %arg3[%c0_2, %c0_3] : memref<8x1xi32, #tpu.memory_space<vmem>>, vector<8x1xi32>
    %cst = arith.constant dense<0xFF800000> : vector<8xf32>
    %6 = vector.multi_reduction <maximumf>, %4, %cst [1] : vector<8x128xf32> to vector<8xf32>
    %7 = vector.shape_cast %6 : vector<8xf32> to vector<8x1xf32>
    %8 = vector.broadcast %7 : vector<8x1xf32> to vector<8x128xf32>
    %9 = arith.subf %4, %8 : vector<8x128xf32>
    %10 = math.exp %9 : vector<8x128xf32>
    %cst_4 = arith.constant dense<0.000000e+00> : vector<8xf32>
    %11 = vector.multi_reduction <add>, %10, %cst_4 [1] : vector<8x128xf32> to vector<8xf32>
    %12 = vector.shape_cast %11 : vector<8xf32> to vector<8x1xf32>
    %13 = math.log %12 : vector<8x1xf32>
    %cst_5 = arith.constant 1.000000e+00 : f32
    %14 = vector.broadcast %cst_5 : f32 to vector<8x1xf32>
    %15 = arith.divf %14, %12 : vector<8x1xf32>
    %cst_6 = arith.constant dense<0.000000e+00> : vector<8xf32>
    %16 = vector.multi_reduction <add>, %9, %cst_6 [1] : vector<8x128xf32> to vector<8xf32>
    %17 = vector.shape_cast %16 : vector<8xf32> to vector<8x1xf32>
    %18 = tpu.iota {dimensions = array<i32: 1>} : vector<8x128xi32>
    %19 = vector.broadcast %5 : vector<8x1xi32> to vector<8x128xi32>
    %20 = arith.cmpi eq, %18, %19 : vector<8x128xi32>
    %cst_7 = arith.constant 0.000000e+00 : f32
    %21 = vector.broadcast %cst_7 : f32 to vector<8x128xf32>
    %22 = arith.select %20, %9, %21 : vector<8x128xi1>, vector<8x128xf32>
    %cst_8 = arith.constant dense<0.000000e+00> : vector<8xf32>
    %23 = vector.multi_reduction <add>, %22, %cst_8 [1] : vector<8x128xf32> to vector<8xf32>
    %24 = vector.shape_cast %23 : vector<8xf32> to vector<8x1xf32>
    %25 = arith.subf %24, %13 : vector<8x1xf32>
    %cst_9 = arith.constant 1.280000e+02 : f32
    %26 = vector.broadcast %cst_9 : f32 to vector<8x1xf32>
    %27 = arith.mulf %26, %13 : vector<8x1xf32>
    %28 = arith.subf %17, %27 : vector<8x1xf32>
    %cst_10 = arith.constant 1.000000e-01 : f32
    %29 = vector.broadcast %cst_10 : f32 to vector<8x1xf32>
    %cst_11 = arith.constant 0.699999988 : f32
    %30 = vector.broadcast %cst_11 : f32 to vector<8x1xf32>
    %31 = arith.cmpf oge, %15, %30 : vector<8x1xf32>
    %cst_12 = arith.constant 3.000000e-01 : f32
    %32 = vector.broadcast %cst_12 : f32 to vector<8x1xf32>
    %33 = arith.select %31, %32, %29 : vector<8x1xi1>, vector<8x1xf32>
    %cst_13 = arith.constant 3.000000e-01 : f32
    %34 = vector.broadcast %cst_13 : f32 to vector<8x1xf32>
    %35 = arith.cmpf ole, %15, %34 : vector<8x1xf32>
    %cst_14 = arith.constant 0.000000e+00 : f32
    %36 = vector.broadcast %cst_14 : f32 to vector<8x1xf32>
    %37 = arith.select %35, %36, %33 : vector<8x1xi1>, vector<8x1xf32>
    %cst_15 = arith.constant 1.270000e+02 : f32
    %38 = vector.broadcast %cst_15 : f32 to vector<8x1xf32>
    %39 = arith.divf %37, %38 : vector<8x1xf32>
    %cst_16 = arith.constant 1.280000e+02 : f32
    %40 = vector.broadcast %cst_16 : f32 to vector<8x1xf32>
    %41 = arith.mulf %40, %39 : vector<8x1xf32>
    %cst_17 = arith.constant 1.000000e+00 : f32
    %42 = vector.broadcast %cst_17 : f32 to vector<8x1xf32>
    %43 = arith.subf %42, %41 : vector<8x1xf32>
    %cst_18 = arith.constant 0.000000e+00 : f32
    %44 = vector.broadcast %cst_18 : f32 to vector<8x1xf32>
    %45 = arith.cmpf ogt, %39, %44 : vector<8x1xf32>
    %cst_19 = arith.constant 1.000000e+00 : f32
    %46 = vector.broadcast %cst_19 : f32 to vector<8x1xf32>
    %47 = arith.select %45, %39, %46 : vector<8x1xi1>, vector<8x1xf32>
    %cst_20 = arith.constant 0.000000e+00 : f32
    %48 = vector.broadcast %cst_20 : f32 to vector<8x1xf32>
    %49 = arith.cmpf ogt, %43, %48 : vector<8x1xf32>
    %cst_21 = arith.constant 1.000000e+00 : f32
    %50 = vector.broadcast %cst_21 : f32 to vector<8x1xf32>
    %51 = arith.select %49, %43, %50 : vector<8x1xi1>, vector<8x1xf32>
    %cst_22 = arith.constant 0.000000e+00 : f32
    %52 = vector.broadcast %cst_22 : f32 to vector<8x1xf32>
    %53 = arith.cmpf ogt, %39, %52 : vector<8x1xf32>
    %54 = math.log %47 : vector<8x1xf32>
    %cst_23 = arith.constant 1.270000e+02 : f32
    %55 = vector.broadcast %cst_23 : f32 to vector<8x1xf32>
    %56 = arith.mulf %55, %54 : vector<8x1xf32>
    %57 = arith.subf %28, %25 : vector<8x1xf32>
    %58 = arith.subf %56, %57 : vector<8x1xf32>
    %59 = arith.mulf %39, %58 : vector<8x1xf32>
    %cst_24 = arith.constant 0.000000e+00 : f32
    %60 = vector.broadcast %cst_24 : f32 to vector<8x1xf32>
    %61 = arith.select %53, %59, %60 : vector<8x1xi1>, vector<8x1xf32>
    %cst_25 = arith.constant 0.000000e+00 : f32
    %62 = vector.broadcast %cst_25 : f32 to vector<8x1xf32>
    %63 = arith.cmpf ogt, %43, %62 : vector<8x1xf32>
    %64 = math.log %51 : vector<8x1xf32>
    %65 = arith.subf %64, %25 : vector<8x1xf32>
    %66 = arith.mulf %43, %65 : vector<8x1xf32>
    %cst_26 = arith.constant 0.000000e+00 : f32
    %67 = vector.broadcast %cst_26 : f32 to vector<8x1xf32>
    %68 = arith.select %63, %66, %67 : vector<8x1xi1>, vector<8x1xf32>
    %c0_i32_27 = arith.constant 0 : i32
    %69 = vector.broadcast %c0_i32_27 : i32 to vector<8x1xi32>
    %70 = arith.cmpi ne, %5, %69 : vector<8x1xi32>
    %71 = arith.extui %70 : vector<8x1xi1> to vector<8x1xi32>
    %72 = arith.sitofp %71 : vector<8x1xi32> to vector<8x1xf32>
    %c0_28 = arith.constant 0 : index
    %c0_29 = arith.constant 0 : index
    %73 = vector.load %arg6[%c0_28, %c0_29] : memref<8x1xf32, #tpu.memory_space<vmem>>, vector<8x1xf32>
    %74 = arith.addf %61, %68 : vector<8x1xf32>
    %75 = arith.mulf %74, %72 : vector<8x1xf32>
    %76 = arith.addf %73, %75 : vector<8x1xf32>
    %c0_30 = arith.constant 0 : index
    %c0_31 = arith.constant 0 : index
    %77 = vector.load %arg6[%c0_30, %c0_31] : memref<8x1xf32, #tpu.memory_space<vmem>>, vector<8x1xf32>
    tpu.vector_store %arg6[%c0_30, %c0_31], %76 {strides = array<i32>} : memref<8x1xf32, #tpu.memory_space<vmem>>, vector<8x1xf32>,
    %c0_32 = arith.constant 0 : index
    %c0_33 = arith.constant 0 : index
    %78 = vector.load %arg7[%c0_32, %c0_33] : memref<8x1xf32, #tpu.memory_space<vmem>>, vector<8x1xf32>
    %79 = arith.addf %78, %72 : vector<8x1xf32>
    %c0_34 = arith.constant 0 : index
    %c0_35 = arith.constant 0 : index
    %80 = vector.load %arg7[%c0_34, %c0_35] : memref<8x1xf32, #tpu.memory_space<vmem>>, vector<8x1xf32>
    tpu.vector_store %arg7[%c0_34, %c0_35], %79 {strides = array<i32>} : memref<8x1xf32, #tpu.memory_space<vmem>>, vector<8x1xf32>,
    %c0_i32_36 = arith.constant 0 : i32
    %81 = arith.cmpi eq, %arg1, %c0_i32_36 : i32
    %82 = arith.extui %81 : i1 to i32
    %c0_i32_37 = arith.constant 0 : i32
    %83 = arith.cmpi ne, %82, %c0_i32_37 : i32
    scf.if %83 {
      %c0_38 = arith.constant 0 : index
      %c0_39 = arith.constant 0 : index
      %84 = vector.load %arg6[%c0_38, %c0_39] : memref<8x1xf32, #tpu.memory_space<vmem>>, vector<8x1xf32>
      %85 = vector.shape_cast %84 : vector<8x1xf32> to vector<1x8x1xf32>
      %cst_40 = arith.constant dense<0.000000e+00> : vector<1xf32>
      %86 = vector.multi_reduction <add>, %85, %cst_40 [1, 2] : vector<1x8x1xf32> to vector<1xf32>
      %87 = vector.shape_cast %86 : vector<1xf32> to vector<1x1x1xf32>
      %88 = vector.extract %87[0, 0, 0] : f32 from vector<1x1x1xf32>
      %89 = vector.broadcast %88 : f32 to vector<1x1x1xf32>
      %c0_41 = arith.constant 0 : index
      %c0_42 = arith.constant 0 : index
      %c0_43 = arith.constant 0 : index
      %90 = vector.load %arg4[%c0_41, %c0_42, %c0_43] : memref<1x1x1xf32, #tpu.memory_space<vmem>>, vector<1x1x1xf32>
      tpu.vector_store %arg4[%c0_41, %c0_42, %c0_43], %89 {strides = array<i32>} : memref<1x1x1xf32, #tpu.memory_space<vmem>>, vector<1x1x1xf32>,
      %c0_44 = arith.constant 0 : index
      %c0_45 = arith.constant 0 : index
      %91 = vector.load %arg7[%c0_44, %c0_45] : memref<8x1xf32, #tpu.memory_space<vmem>>, vector<8x1xf32>
      %92 = vector.shape_cast %91 : vector<8x1xf32> to vector<1x8x1xf32>
      %cst_46 = arith.constant dense<0.000000e+00> : vector<1xf32>
      %93 = vector.multi_reduction <add>, %92, %cst_46 [1, 2] : vector<1x8x1xf32> to vector<1xf32>
      %94 = vector.shape_cast %93 : vector<1xf32> to vector<1x1x1xf32>
      %95 = vector.extract %94[0, 0, 0] : f32 from vector<1x1x1xf32>
      %96 = vector.broadcast %95 : f32 to vector<1x1x1xf32>
      %c0_47 = arith.constant 0 : index
      %c0_48 = arith.constant 0 : index
      %c0_49 = arith.constant 0 : index
      %97 = vector.load %arg5[%c0_47, %c0_48, %c0_49] : memref<1x1x1xf32, #tpu.memory_space<vmem>>, vector<1x1x1xf32>
      tpu.vector_store %arg5[%c0_47, %c0_48, %c0_49], %96 {strides = array<i32>} : memref<1x1x1xf32, #tpu.memory_space<vmem>>, vector<1x1x1xf32>,
    } else {
    }
    return
  }
  func.func @transform_0(%arg0: i32, %arg1: i32) -> (i32, i32) {
    %c1_i32 = arith.constant 1 : i32
    %0 = arith.muli %arg0, %c1_i32 : i32
    %1 = arith.addi %0, %arg1 : i32
    %c0_i32 = arith.constant 0 : i32
    %c0_i32_0 = arith.constant 0 : i32
    return %1, %c0_i32 : i32, i32
  }
  func.func @transform_1(%arg0: i32, %arg1: i32) -> (i32, i32) {
    %c1_i32 = arith.constant 1 : i32
    %0 = arith.muli %arg0, %c1_i32 : i32
    %1 = arith.addi %0, %arg1 : i32
    %c0_i32 = arith.constant 0 : i32
    %c0_i32_0 = arith.constant 0 : i32
    return %1, %c0_i32 : i32, i32
  }
  func.func @transform_2(%arg0: i32, %arg1: i32) -> (i32, i32, i32) {
    %c0_i32 = arith.constant 0 : i32
    %c0_i32_0 = arith.constant 0 : i32
    %c0_i32_1 = arith.constant 0 : i32
    return %arg0, %c0_i32, %c0_i32_0 : i32, i32, i32
  }
  func.func @transform_3(%arg0: i32, %arg1: i32) -> (i32, i32, i32) {
    %c0_i32 = arith.constant 0 : i32
    %c0_i32_0 = arith.constant 0 : i32
    %c0_i32_1 = arith.constant 0 : i32
    return %arg0, %c0_i32, %c0_i32_0 : i32, i32, i32
  }
}

</mosaic_0001>

<bundles_post_ra>
// kernel: tpu_custom_call.1
= control target key start
LH: loop header
LB: loop body
LE: loop exit
PB: predicated region body
PF: predicated region fallthrough
CT: control target
= control target key end

     0   :  { %s508_s12 = smov 0   ;;  %s510_s13 = smov 0   ;;  %s563_s0 = inlined_call_operand.vmem [shape: bf16[16,128], index: 0, kind: input, shape index: {}]   ;;  %s564_s1 = inlined_call_operand.vmem [shape: s32[16,1], index: 1, kind: input, shape index: {}]   ;;  %s565_s2 = inlined_call_operand.vmem [shape: f32[2,1,1], index: 2, kind: output, shape index: {0}]   ;;  %s566_s3 = inlined_call_operand.vmem [shape: f32[2,1,1], index: 3, kind: output, shape index: {1}]  }
   0x1   :  { %s512_s14 = smov 0  }
   0x2 LB: > { %s26_s15 = sadd.s32 1, %s479_s13  ;;  %p413_p0 = scmp.ge.s32.totalorder %s483_s14, 1  ;;  %s483_s14 = sphi %s512_s14, %s14_s14   ;;  %s479_s13 = sphi %s510_s13, %s568_s13   ;;  %s475_s12 = sphi %s508_s12, %s567_s12  }
   0x3   : > { %p28_p1 = scmp.ge.s32.totalorder %s26_s15, 2  ;;  %p168_p2 = scmp.lt.s32.totalorder %s483_s14, 3 }
   0x5   : > { %s570_s15 = smov (%p28_p1, %s26_s15), 0  ;;  %p169_p3 = pnand %p413_p0, %p168_p2 }
   0x6   : > { %p199_p4 = scmp.lt.s32.totalorder (!%p169_p3), %s475_s12, 1  ;;  %vm220_vm0 = vcmask (!%p169_p3), 7168   ;;  %v485_v0 = vmov (!%p169_p3), 0   ;;  %v486_v1 = vmov (!%p169_p3), 0.0   ;;  %v239_v11 = vlaneseq (!%p169_p3) }
   0x7   : > { %172 = sbr.rel (%p169_p3) target bundleno = 584 (0x248), region = 28  ;;  %450 = vset.pattern.permute.xlu0 (!%p169_p3), %v485_v0  ;;  %221 = vst.msk [vmem:[#allocation2] sm:$0xff] (!%p169_p3), %vm220_vm0, %v486_v1  ;;  %222 = vst.msk [vmem:[#allocation3] sm:$0xff] (!%p169_p3), %vm220_vm0, %v486_v1  ;;  %v487_v18 = vmov (!%p169_p3), 0.1   ;;  %vm302_vm7 = vcmask (!%p169_p3), 0  }
   0x8   : > { %v240_v13 = vand.u32 (!%p169_p3), 127, %v239_v11 }
   0xe   : > { %s572_s12 = smov (!%p199_p4, %s475_s12), 1  ;;  %v284_v6 = vld [vmem:[#allocation3] sm:$0xff]  ;;  %v278_v46 = vld [vmem:[#allocation2] sm:$0xff] }
   0xf   : > { %s414_s16 = sshll.u32 %s572_s12, 2  ;;  %s415_s17 = sshll.u32 %s572_s12, 3 }
  0x10   : > { %s202_s20 = scalar_lea.vmem %s563_s0, %s414_s16  ;;  %s208_s23 = scalar_lea.vmem %s564_s1, %s415_s17 }
  0x11   : > { %v223_v2 = vld [vmem:[%s202_s20] sm:$0xf]  ;;  %s212_s26 = scalar_lea.vmem %s565_s2, %s572_s12  ;;  %s215_s30 = scalar_lea.vmem %s566_s3, %s572_s12 }
  0x12   : > { %v225_v3 = vld [vmem:[%s208_s23] sm:$0xff]  ;;  %v224_v4 = vunpack.c.l.bf16 %v223_v2 }
  0x13   : > { %vm275_vm1 = vcmp.ne.s32.totalorder %v225_v3, 0 }
  0x14   : > { %v416_v5 = vsel %vm275_vm1, 1.0, %v486_v1  ;;  %226 = vmax.xlane.f32.xlu0 %v224_v4 }
  0x15   : > { %v285_v7 = vadd.f32 %v416_v5, %v284_v6 }
  0x17   : > { %286 = vst.msk [vmem:[#allocation3] sm:$0xff] %vm220_vm0, %v285_v7 }
  0x1e   : > { %v304_v50 = vld [vmem:[#allocation3] sm:$0xff] }
  0x1f   : > { %v305_v52 = vsel %vm220_vm0, %v304_v50, 0.0 }
  0x2a   : > { %242 = vperm.xlu0 %450, %v225_v3  }
  0xa1   : > { %v227_v8 = vpop.xlane.xlu0 %226 }
  0xa2   : > { %v228_v9 = vsub.f32 %v224_v4, %v227_v8 }
  0xa4   : > { %v229_v10 = vmul.f32 1.442695, %v228_v9 }
  0xa6   : > { %451 = vpow2.f32 %v229_v10 }
  0xa9   : > { %v243_v14 = vpop.permute.xlu0 %242 }
  0xaa   : > { %vm244_vm2 = vcmp.eq.s32.totalorder %v240_v13, %v243_v14 }
  0xab   : > { %v245_v15 = vsel %vm244_vm2, %v228_v9, 0.0 }
  0xb0   : > { %v452_v12 = vpop.eup %451 }
  0xb1   : > { %231 = vadd.xlane.f32.xlu1 %v452_v12 }
  0xb5   : > { %237 = vadd.xlane.f32.xlu1 %v228_v9 }
  0xb9   : > { %246 = vadd.xlane.f32.xlu1 %v245_v15 }
 0x13e   : > { %v232_v16 = vpop.xlane.xlu1 %231 }
 0x13f   : > { %453 = vrcp.f32 %v232_v16 }
 0x140   : > { %455 = vlog2.f32 %v232_v16 }
 0x142   : > { %v238_v28 = vpop.xlane.xlu1 %237 }
 0x146   : > { %v247_v32 = vpop.xlane.xlu1 %246 }
 0x149   : > { %v454_v17 = vpop.eup %453 }
 0x14a   : > { %vm251_vm3 = vcmp.ge.f32.partialorder %v454_v17, 0.7  ;;  %vm253_vm4 = vcmp.le.f32.partialorder %v454_v17, 0.3  ;;  %v456_v22 = vpop.eup %455 }
 0x14b   : > { %v252_v19 = vsel %vm251_vm3, 0.3, %v487_v18  ;;  %v234_v26 = vmul.f32 0.6931472, %v456_v22 }
 0x14c   : > { %v254_v20 = vsel %vm253_vm4, 0.0, %v252_v19 }
 0x14d   : > { %v256_v21 = vmul.f32 0.007874016, %v254_v20  ;;  %v249_v29 = vmul.f32 128.0, %v234_v26  ;;  %v248_v34 = vsub.f32 %v247_v32, %v234_v26 }
 0x14f   : > { %v257_v23 = vmul.f32 128.0, %v256_v21  ;;  %vm259_vm5 = vcmp.gt.f32.partialorder %v256_v21, 0.0  ;;  %v250_v30 = vsub.f32 %v238_v28, %v249_v29 }
 0x150   : > { %v260_v24 = vsel %vm259_vm5, %v256_v21, 1.0 }
 0x151   : > { %v258_v25 = vsub.f32 1.0, %v257_v23  ;;  %457 = vlog2.f32 %v260_v24  ;;  %v266_v36 = vsub.f32 %v250_v30, %v248_v34 }
 0x153   : > { %vm261_vm6 = vcmp.gt.f32.partialorder %v258_v25, 0.0 }
 0x154   : > { %v262_v27 = vsel %vm261_vm6, %v258_v25, 1.0 }
 0x155   : > { %459 = vlog2.f32 %v262_v27 }
 0x15b   : > { %v458_v31 = vpop.eup %457 }
 0x15c   : > { %v264_v33 = vmul.f32 0.6931472, %v458_v31 }
 0x15e   : > { %v265_v35 = vmul.f32 127.0, %v264_v33 }
 0x15f   : > { %v460_v37 = vpop.eup %459 }
 0x160   : > { %v271_v38 = vmul.f32 0.6931472, %v460_v37  ;;  %v267_v39 = vsub.f32 %v265_v35, %v266_v36 }
 0x162   : > { %v268_v40 = vmul.f32 %v267_v39, %v256_v21  ;;  %v272_v41 = vsub.f32 %v271_v38, %v248_v34 }
 0x164   : > { %v273_v42 = vmul.f32 %v272_v41, %v258_v25  ;;  %v269_v43 = vsel %vm259_vm5, %v268_v40, 0.0 }
 0x166   : > { %v274_v44 = vsel %vm261_vm6, %v273_v42, 0.0 }
 0x167   : > { %v279_v45 = vadd.f32 %v274_v44, %v269_v43 }
 0x169   : > { %v280_v47 = vmul.f32 %v416_v5, %v279_v45 }
 0x16b   : > { %v281_v48 = vadd.f32 %v280_v47, %v278_v46 }
 0x16d   : > { %283 = vst.msk [vmem:[#allocation2] sm:$0xff] %vm220_vm0, %v281_v48 }
 0x174   : > { %v290_v49 = vld [vmem:[#allocation2] sm:$0xff] }
 0x175   : > { %v291_v51 = vsel %vm220_vm0, %v290_v49, 0.0 }
 0x176   : > { %292 = vadd.xlane.f32.xlu1 %v291_v51 }
 0x17a   : > { %306 = vadd.xlane.f32.xlu1 %v305_v52 }
 0x203   : > { %v293_v53 = vpop.xlane.xlu1 %292 }
 0x204   : > { %v294_v54 = vrot.slane %v293_v53, 4 }
 0x206   : > { %v295_v55 = vadd.f32 %v294_v54, %v293_v53 }
 0x207   : > { %v307_v56 = vpop.xlane.xlu1 %306 }
 0x208   : > { %v296_v57 = vrot.slane %v295_v55, 2  ;;  %v308_v58 = vrot.slane %v307_v56, 4 }
 0x20a   : > { %v309_v59 = vadd.f32 %v308_v58, %v307_v56  ;;  %v297_v60 = vadd.f32 %v296_v57, %v295_v55 }
 0x20c   : > { %v310_v61 = vrot.slane %v309_v59, 2  ;;  %v298_v62 = vrot.slane %v297_v60, 1 }
 0x20e   : > { %v311_v63 = vadd.f32 %v310_v61, %v309_v59  ;;  %v299_v0 = vadd.f32 %v298_v62, %v297_v60 }
 0x210   : > { %419 = vpush %v299_v0  ;;  %v312_v1 = vrot.slane %v311_v63, 1 }
 0x212   : > { %v313_v2 = vadd.f32 %v312_v1, %v311_v63 }
 0x214   : > { %421 = vpush %v313_v2 }
 0x241   : > { %s420_s27 = spop %419 }
 0x242   : > { %v301_v3 = vstv %s420_s27 }
 0x243   : > { %303 = vst.msk [vmem:[%s212_s26] sm:$0x1] %vm302_vm7, %v301_v3 }
 0x245   : > { %s422_s4 = spop %421 }
 0x246   : > { %v315_v4 = vstv %s422_s4 }
 0x247   : > { %316 = vst.msk [vmem:[%s215_s30] sm:$0x1] %vm302_vm7, %v315_v4 }
 0x248 PF: > { %s14_s14 = sadd.s32 1, %s483_s14   ;;  %s567_s12 = smov %s479_s13 }
 0x249   : > { %p11_p5 = scmp.ge.s32.totalorder %s14_s14, 4   ;;  %s568_s13 = smov %s570_s15 }
 0x24b   :  { %13 = sbr.rel (!%p11_p5) target bundleno = 2 (0x2), region = 81 }

</bundles_post_ra>
